<compile_context>
chip_gen: v6e
topology: v6e:2x2x1
jax: 0.10.0
libtpu: 0.0.40
codegen_flags: <defaults>
</compile_context>

<pallas_src>
import functools
import math

import numpy as np
import jax
import jax.numpy as jnp
from jax import lax
from jax.experimental import pallas as pl
from jax.experimental.pallas import tpu as pltpu

_TINY = 1e-30  # zero threshold / log clamp (well above f32 denormal flush-to-zero)


def thnn_kernel(R, E, emb_ref, wf_ref, bf_ref, w2p_ref, b2_ref, wqr_ref,
                bq_ref, h_ref, hinv_ref, hinvr_ref, loga_ref, out_ref):
    contract_n = (((0,), (0,)), ((), ()))       # contract over the node axis (dim 0 / dim 0)

    # ---- front-end MLPs: one fused matmul shares `emb` ----------------------
    front = jnp.dot(emb_ref[...], wf_ref[...],
                    preferred_element_type=jnp.float32) + bf_ref[...]        # [N, R+Hd]
    emb_new = front[:, :R]                                                   # [N, R] p_network
    # p2_network tail: relu -> Linear.  w2_pad has zero rows over the first R
    # columns of `front`, so no lane-offset slice of the hidden part is needed.
    emb_new2 = jnp.dot(jnp.maximum(front, 0.0).astype(jnp.bfloat16), w2p_ref[...],
                       preferred_element_type=jnp.float32) + b2_ref[...]     # [N, O]

    h = h_ref[...]                                                           # [N, E] (0/1)

    # ---- per-edge sums over member nodes (all on the MXU; no H^T input) -----
    edge_emb2 = lax.dot_general(h, emb_new2, contract_n,
                                preferred_element_type=jnp.float32)          # [E, O]

    # Log-space decomposition of the exclude-self member product.
    absx = jnp.abs(emb_new)
    absl = jnp.log(jnp.maximum(absx, _TINY))                                 # [N, R]
    negc = (emb_new < 0.0).astype(jnp.float32)                               # [N, R]
    zc = (absx < _TINY).astype(jnp.float32)                                  # [N, R]

    # Split-float edge-sum of absl: the bf16 "hi" part makes the single-pass
    # MXU products exact, and the "lo" residual contributes O(2^-18) relative
    # error -> ~f32 accuracy from two cheap single-pass matmuls.
    absl_hi = absl.astype(jnp.bfloat16).astype(jnp.float32)
    absl_lo = absl - absl_hi
    sl = (lax.dot_general(h, absl_hi, contract_n, preferred_element_type=jnp.float32) +
          lax.dot_general(h, absl_lo, contract_n, preferred_element_type=jnp.float32))
    sn = lax.dot_general(h, negc, contract_n, preferred_element_type=jnp.float32)  # exact ints
    sz = lax.dot_general(h, zc, contract_n, preferred_element_type=jnp.float32)    # exact ints

    # Fold the per-edge constant log A_j = log( coef_j * prod_k deg_k^(1/n_j) ).
    sl = sl + loga_ref[...]                                                  # [E, R] + [E, 1]

    # ---- lane-dense [*, E*R] layout (lane concat only; no minor-dim reshape) -
    def rows_to_lanes(x):        # [E, R] -> [1, E*R], element (0, j*R + r) = x[j, r]
        return jnp.concatenate([x[j:j + 1, :] for j in range(E)], axis=1)

    def tile_lanes(x):           # [N, R] -> [N, E*R], element (i, j*R + r) = x[i, r]
        return jnp.concatenate([x] * E, axis=1)

    excl_l = rows_to_lanes(sl) - tile_lanes(absl)                            # [N, E*R]
    excl_n = rows_to_lanes(sn) - tile_lanes(negc)                            # [N, E*R]
    excl_z = rows_to_lanes(sz) - tile_lanes(zc)                              # [N, E*R]

    parity = excl_n - 2.0 * jnp.floor(excl_n * 0.5)                          # exact 0/1
    sign = 1.0 - 2.0 * parity
    # Clamp the exponent: anything past ~e^30 is tanh == 1 in f32 anyway, and
    # the clamp keeps non-member lanes (zeroed by hinv_rep below) finite.
    prod = sign * jnp.exp(jnp.minimum(excl_l, 30.0))                         # EUP exp
    node_emb = jnp.tanh(jnp.where(excl_z > 0.5, 0.0, prod))                  # EUP tanh

    # ---- per-node mean over member edges -------------------------------------
    # q_network is linear so the edge mean commutes with it; 1/degree lives in
    # hinv / hinv_rep and wq_rep = tile(Wq, (E, 1)) makes the whole thing one
    # lane-dense [N, E*R] @ [E*R, O] MXU matmul.  bq is added exactly once
    # because sum_j hinv[i, j] == 1.
    weighted = (hinvr_ref[...] * node_emb).astype(jnp.bfloat16)              # [N, E*R]
    q_term = jnp.dot(weighted, wqr_ref[...],
                     preferred_element_type=jnp.float32) + bq_ref[...]       # [N, O]
    r_term = jnp.dot(hinv_ref[...], jnp.maximum(edge_emb2, 0.0),
                     preferred_element_type=jnp.float32)                     # [N, O]
    out_ref[...] = jnp.maximum(q_term + r_term, 0.0)


def thnn_forward(H_np, embedding, params):
    """Derive the hypergraph scalars (numpy glue) and run the fused Pallas kernel."""
    H64 = np.asarray(H_np, dtype=np.float64)
    N, E = H64.shape
    degree = H64.sum(axis=1)                              # [N] node degrees
    node_num = H64.sum(axis=0)                            # [E] nodes per edge
    # TODO(synk): isolated nodes (degree 0) are guarded to a zero row here; the
    # reference module's behaviour for that case is ill-defined.
    safe_deg = np.maximum(degree, 1.0)
    h_inv = (H64 / safe_deg[:, None]).astype(np.float32)  # [N, E] mean weights
    log_deg = np.log(safe_deg)
    loga = np.empty((E, 1), dtype=np.float64)
    for j in range(E):
        n_j = max(int(node_num[j]), 1)
        # A_j = 1/(n_j-1)! * prod_{k in edge j} deg_k^(1/n_j)  (same for every member i)
        loga[j, 0] = -math.lgamma(n_j) + float((H64[:, j] * log_deg).sum()) / n_j

    R = params["Wp"].shape[1]
    O = params["Wq"].shape[1]

    # Fuse the two matmuls that share `emb`; zero-pad W2 so relu(front) @ w2_pad
    # reproduces relu(emb @ W1 + b1) @ W2 without slicing the hidden columns.
    w_front = jnp.concatenate([params["Wp"], params["W1"]], axis=1).astype(jnp.bfloat16)
    b_front = jnp.concatenate([params["bp"], params["b1"]], axis=1).astype(jnp.float32)
    w2_pad = jnp.concatenate([jnp.zeros((R, O), jnp.float32), params["W2"]],
                             axis=0).astype(jnp.bfloat16)                    # [R+Hd, O]
    # Wq tiled over edges: (mean over edges) @ Wq becomes one [N,E*R]@[E*R,O] matmul.
    wq_rep = jnp.asarray(np.tile(np.asarray(params["Wq"], np.float32), (E, 1)),
                         dtype=jnp.bfloat16)                                 # [E*R, O]
    hinv_rep = jnp.asarray(np.repeat(h_inv, R, axis=1))                      # [N, E*R]

    inputs = (
        jnp.asarray(embedding, jnp.bfloat16),    # per-node streamed input (bf16 halves DMA)
        w_front, b_front, w2_pad,
        jnp.asarray(params["b2"], jnp.float32),
        wq_rep,
        jnp.asarray(params["bq"], jnp.float32),
        jnp.asarray(H64, jnp.float32),           # single copy of the incidence matrix
        jnp.asarray(h_inv),
        hinv_rep,
        jnp.asarray(loga, jnp.float32),
    )

    kernel = functools.partial(thnn_kernel, R, E)
    return pl.pallas_call(
        kernel,
        out_shape=jax.ShapeDtypeStruct((N, O), jnp.float32),
        in_specs=[pl.BlockSpec(memory_space=pltpu.MemorySpace.VMEM)] * len(inputs),
        out_specs=pl.BlockSpec(memory_space=pltpu.MemorySpace.VMEM),
    )(*inputs)


def reference_forward(H_np, emb, p):
    """Direct numpy translation of the PyTorch loops (eval mode), in float64."""
    H_np = np.asarray(H_np, dtype=np.float32)
    emb = np.asarray(emb, dtype=np.float64)
    Wp, bp = np.asarray(p["Wp"], np.float64), np.asarray(p["bp"], np.float64)[0]
    W1, b1 = np.asarray(p["W1"], np.float64), np.asarray(p["b1"], np.float64)[0]
    W2, b2 = np.asarray(p["W2"], np.float64), np.asarray(p["b2"], np.float64)[0]
    Wq, bq = np.asarray(p["Wq"], np.float64), np.asarray(p["bq"], np.float64)[0]
    N, E = H_np.shape
    R, O = Wp.shape[1], Wq.shape[1]
    emb_new = emb @ Wp + bp
    emb_new2 = np.maximum(emb @ W1 + b1, 0.0) @ W2 + b2
    degree = H_np.sum(axis=1)
    node_num = H_np.sum(axis=0)
    rows = []
    for i in range(N):
        q_rows, r_rows = [], []
        for j in range(E):
            if H_np[i, j] != 1.0:
                continue
            nnum = int(node_num[j])
            edge_emb = np.ones(R, dtype=np.float64)
            edge_emb2 = np.zeros(O, dtype=np.float64)
            for k in range(N):
                if H_np[k, j] != 1.0:
                    continue
                if k != i:
                    num = degree[k] ** (1.0 / nnum)
                    edge_emb = edge_emb * (num * emb_new[k])
                edge_emb2 = edge_emb2 + emb_new2[k]
            num = degree[i] ** (1.0 / nnum)
            q_rows.append(np.tanh((1.0 / math.factorial(nnum - 1)) * num * edge_emb))
            r_rows.append(edge_emb2)
        q_rows, r_rows = np.stack(q_rows), np.stack(r_rows)
        node_out = (q_rows @ Wq + bq + np.maximum(r_rows, 0.0)).mean(axis=0)
        rows.append(node_out)
    return np.maximum(np.stack(rows), 0.0)


if __name__ == "__main__":
    # Small shapes consistent with the module:
    F, Hd, O, R = 32, 32, 16, 16          # featdim, hiddendim, outputdim, rank
    N, E = 8, 5                           # hypergraph: 8 nodes, 5 hyperedges

    # Deterministic incidence matrix (every node belongs to >= 1 edge).
    edges = [(0, 1, 2), (2, 3, 4), (4, 5, 6), (6, 7, 0), (1, 3, 5, 7)]
    H_np = np.zeros((N, E), dtype=np.float32)
    for j, nodes in enumerate(edges):
        for n in nodes:
            H_np[n, j] = 1.0

    # Deterministic parameter / input init.
    key = jax.random.PRNGKey(0)
    ks = jax.random.split(key, 8)
    params = {
        # p_network Linear(featdim, rank): normal(0, sqrt(1/(featdim+1))), bias 0
        "Wp": jax.random.normal(ks[0], (F, R), jnp.float32) * math.sqrt(1.0 / (F + 1)),
        "bp": jnp.zeros((1, R), jnp.float32),
        # p2_network Linear(featdim, hiddendim), Linear(hiddendim, outputdim)
        "W1": jax.random.normal(ks[1], (F, Hd), jnp.float32) * math.sqrt(1.0 / F),
        "b1": jax.random.normal(ks[2], (1, Hd), jnp.float32) * 0.05,
        "W2": jax.random.normal(ks[3], (Hd, O), jnp.float32) * math.sqrt(1.0 / Hd),
        "b2": jax.random.normal(ks[4], (1, O), jnp.float32) * 0.05,
        # q_network Linear(rank, outputdim)
        "Wq": jax.random.normal(ks[5], (R, O), jnp.float32) * math.sqrt(1.0 / R),
        "bq": jax.random.normal(ks[6], (1, O), jnp.float32) * 0.05,
    }
    embedding = jax.random.normal(ks[7], (N, F), jnp.float32)

    out = thnn_forward(H_np, embedding, params)
    out = jax.block_until_ready(out)

    # Reference is float64; the kernel stores MXU operands in bf16 and relies on
    # single-pass (DEFAULT-precision) MXU matmuls, so use the same 2e-2 tolerance
    # the previous (numerically equivalent) version validated against.
    ref = reference_forward(H_np, embedding, params)
    np.testing.assert_allclose(np.asarray(out, dtype=np.float64), ref,
                               rtol=2e-2, atol=2e-2)

    print("KERNEL_OK")
</pallas_src>

<mosaic_0001>
module attributes {stable_mosaic.version = 11 : i64} {
  func.func @thnn_kernel(%arg0: memref<8x32xbf16, #tpu.memory_space<vmem>>, %arg1: memref<32x48xbf16, #tpu.memory_space<vmem>>, %arg2: memref<1x48xf32, #tpu.memory_space<vmem>>, %arg3: memref<48x16xbf16, #tpu.memory_space<vmem>>, %arg4: memref<1x16xf32, #tpu.memory_space<vmem>>, %arg5: memref<80x16xbf16, #tpu.memory_space<vmem>>, %arg6: memref<1x16xf32, #tpu.memory_space<vmem>>, %arg7: memref<8x5xf32, #tpu.memory_space<vmem>>, %arg8: memref<8x5xf32, #tpu.memory_space<vmem>>, %arg9: memref<8x80xf32, #tpu.memory_space<vmem>>, %arg10: memref<5x1xf32, #tpu.memory_space<vmem>>, %arg11: memref<8x16xf32, #tpu.memory_space<vmem>>) attributes {dimension_semantics = [], scalar_prefetch = 0 : i64, scratch_operands = 0 : i64, tpu.core_type = #tpu.core_type<tc>} {
    %c0 = arith.constant 0 : index
    %c0_0 = arith.constant 0 : index
    %0 = vector.load %arg0[%c0, %c0_0] : memref<8x32xbf16, #tpu.memory_space<vmem>>, vector<8x32xbf16>
    %c0_1 = arith.constant 0 : index
    %c0_2 = arith.constant 0 : index
    %1 = vector.load %arg1[%c0_1, %c0_2] : memref<32x48xbf16, #tpu.memory_space<vmem>>, vector<32x48xbf16>
    %cst = arith.constant dense<0.000000e+00> : vector<8x48xf32>
    %2 = tpu.matmul %0, %1, %cst {dimension_numbers = #tpu.dot_dimension_numbers<[1], [0], [0], [1], [0, 0, 1, 1], [], []>} : vector<8x32xbf16>, vector<32x48xbf16>, vector<8x48xf32> -> vector<8x48xf32>
    %c0_3 = arith.constant 0 : index
    %c0_4 = arith.constant 0 : index
    %3 = vector.load %arg2[%c0_3, %c0_4] : memref<1x48xf32, #tpu.memory_space<vmem>>, vector<1x48xf32>
    %4 = vector.broadcast %3 : vector<1x48xf32> to vector<8x48xf32>
    %5 = arith.addf %2, %4 : vector<8x48xf32>
    %6 = vector.extract_strided_slice %5 {offsets = [0, 0], sizes = [8, 16], strides = [1, 1]} : vector<8x48xf32> to vector<8x16xf32>
    %cst_5 = arith.constant 0.000000e+00 : f32
    %7 = vector.broadcast %cst_5 : f32 to vector<8x48xf32>
    %8 = arith.maximumf %5, %7 : vector<8x48xf32>
    %9 = arith.truncf %8 : vector<8x48xf32> to vector<8x48xbf16>
    %c0_6 = arith.constant 0 : index
    %c0_7 = arith.constant 0 : index
    %10 = vector.load %arg3[%c0_6, %c0_7] : memref<48x16xbf16, #tpu.memory_space<vmem>>, vector<48x16xbf16>
    %cst_8 = arith.constant dense<0.000000e+00> : vector<8x16xf32>
    %11 = tpu.matmul %9, %10, %cst_8 {dimension_numbers = #tpu.dot_dimension_numbers<[1], [0], [0], [1], [0, 0, 1, 1], [], []>} : vector<8x48xbf16>, vector<48x16xbf16>, vector<8x16xf32> -> vector<8x16xf32>
    %c0_9 = arith.constant 0 : index
    %c0_10 = arith.constant 0 : index
    %12 = vector.load %arg4[%c0_9, %c0_10] : memref<1x16xf32, #tpu.memory_space<vmem>>, vector<1x16xf32>
    %13 = vector.broadcast %12 : vector<1x16xf32> to vector<8x16xf32>
    %14 = arith.addf %11, %13 : vector<8x16xf32>
    %c0_11 = arith.constant 0 : index
    %c0_12 = arith.constant 0 : index
    %15 = vector.load %arg7[%c0_11, %c0_12] : memref<8x5xf32, #tpu.memory_space<vmem>>, vector<8x5xf32>
    %cst_13 = arith.constant dense<0.000000e+00> : vector<5x16xf32>
    %16 = tpu.matmul %15, %14, %cst_13 {dimension_numbers = #tpu.dot_dimension_numbers<[0], [0], [1], [1], [0, 1, 1, 1], [], []>} : vector<8x5xf32>, vector<8x16xf32>, vector<5x16xf32> -> vector<5x16xf32>
    %17 = math.absf %6 : vector<8x16xf32>
    %cst_14 = arith.constant 1.000000e-30 : f32
    %18 = vector.broadcast %cst_14 : f32 to vector<8x16xf32>
    %19 = arith.maximumf %17, %18 : vector<8x16xf32>
    %20 = math.log %19 : vector<8x16xf32>
    %cst_15 = arith.constant 0.000000e+00 : f32
    %21 = vector.broadcast %cst_15 : f32 to vector<8x16xf32>
    %22 = arith.cmpf olt, %6, %21 : vector<8x16xf32>
    %23 = arith.extui %22 : vector<8x16xi1> to vector<8x16xi32>
    %24 = arith.sitofp %23 : vector<8x16xi32> to vector<8x16xf32>
    %cst_16 = arith.constant 1.000000e-30 : f32
    %25 = vector.broadcast %cst_16 : f32 to vector<8x16xf32>
    %26 = arith.cmpf olt, %17, %25 : vector<8x16xf32>
    %27 = arith.extui %26 : vector<8x16xi1> to vector<8x16xi32>
    %28 = arith.sitofp %27 : vector<8x16xi32> to vector<8x16xf32>
    %29 = arith.truncf %20 : vector<8x16xf32> to vector<8x16xbf16>
    %30 = arith.extf %29 : vector<8x16xbf16> to vector<8x16xf32>
    %31 = arith.subf %20, %30 : vector<8x16xf32>
    %cst_17 = arith.constant dense<0.000000e+00> : vector<5x16xf32>
    %32 = tpu.matmul %15, %30, %cst_17 {dimension_numbers = #tpu.dot_dimension_numbers<[0], [0], [1], [1], [0, 1, 1, 1], [], []>} : vector<8x5xf32>, vector<8x16xf32>, vector<5x16xf32> -> vector<5x16xf32>
    %cst_18 = arith.constant dense<0.000000e+00> : vector<5x16xf32>
    %33 = tpu.matmul %15, %31, %cst_18 {dimension_numbers = #tpu.dot_dimension_numbers<[0], [0], [1], [1], [0, 1, 1, 1], [], []>} : vector<8x5xf32>, vector<8x16xf32>, vector<5x16xf32> -> vector<5x16xf32>
    %34 = arith.addf %32, %33 : vector<5x16xf32>
    %cst_19 = arith.constant dense<0.000000e+00> : vector<5x16xf32>
    %35 = tpu.matmul %15, %24, %cst_19 {dimension_numbers = #tpu.dot_dimension_numbers<[0], [0], [1], [1], [0, 1, 1, 1], [], []>} : vector<8x5xf32>, vector<8x16xf32>, vector<5x16xf32> -> vector<5x16xf32>
    %cst_20 = arith.constant dense<0.000000e+00> : vector<5x16xf32>
    %36 = tpu.matmul %15, %28, %cst_20 {dimension_numbers = #tpu.dot_dimension_numbers<[0], [0], [1], [1], [0, 1, 1, 1], [], []>} : vector<8x5xf32>, vector<8x16xf32>, vector<5x16xf32> -> vector<5x16xf32>
    %c0_21 = arith.constant 0 : index
    %c0_22 = arith.constant 0 : index
    %37 = vector.load %arg10[%c0_21, %c0_22] : memref<5x1xf32, #tpu.memory_space<vmem>>, vector<5x1xf32>
    %38 = vector.broadcast %37 : vector<5x1xf32> to vector<5x16xf32>
    %39 = arith.addf %34, %38 : vector<5x16xf32>
    %40 = vector.extract_strided_slice %39 {offsets = [0, 0], sizes = [1, 16], strides = [1, 1]} : vector<5x16xf32> to vector<1x16xf32>
    %41 = vector.extract_strided_slice %39 {offsets = [1, 0], sizes = [1, 16], strides = [1, 1]} : vector<5x16xf32> to vector<1x16xf32>
    %42 = vector.extract_strided_slice %39 {offsets = [2, 0], sizes = [1, 16], strides = [1, 1]} : vector<5x16xf32> to vector<1x16xf32>
    %43 = vector.extract_strided_slice %39 {offsets = [3, 0], sizes = [1, 16], strides = [1, 1]} : vector<5x16xf32> to vector<1x16xf32>
    %44 = vector.extract_strided_slice %39 {offsets = [4, 0], sizes = [1, 16], strides = [1, 1]} : vector<5x16xf32> to vector<1x16xf32>
    %45 = tpu.concatenate %40, %41, %42, %43, %44 in 1 : vector<1x16xf32>, vector<1x16xf32>, vector<1x16xf32>, vector<1x16xf32>, vector<1x16xf32> -> vector<1x80xf32>
    %46 = tpu.concatenate %20, %20, %20, %20, %20 in 1 : vector<8x16xf32>, vector<8x16xf32>, vector<8x16xf32>, vector<8x16xf32>, vector<8x16xf32> -> vector<8x80xf32>
    %47 = vector.broadcast %45 : vector<1x80xf32> to vector<8x80xf32>
    %48 = arith.subf %47, %46 : vector<8x80xf32>
    %49 = vector.extract_strided_slice %35 {offsets = [0, 0], sizes = [1, 16], strides = [1, 1]} : vector<5x16xf32> to vector<1x16xf32>
    %50 = vector.extract_strided_slice %35 {offsets = [1, 0], sizes = [1, 16], strides = [1, 1]} : vector<5x16xf32> to vector<1x16xf32>
    %51 = vector.extract_strided_slice %35 {offsets = [2, 0], sizes = [1, 16], strides = [1, 1]} : vector<5x16xf32> to vector<1x16xf32>
    %52 = vector.extract_strided_slice %35 {offsets = [3, 0], sizes = [1, 16], strides = [1, 1]} : vector<5x16xf32> to vector<1x16xf32>
    %53 = vector.extract_strided_slice %35 {offsets = [4, 0], sizes = [1, 16], strides = [1, 1]} : vector<5x16xf32> to vector<1x16xf32>
    %54 = tpu.concatenate %49, %50, %51, %52, %53 in 1 : vector<1x16xf32>, vector<1x16xf32>, vector<1x16xf32>, vector<1x16xf32>, vector<1x16xf32> -> vector<1x80xf32>
    %55 = tpu.concatenate %24, %24, %24, %24, %24 in 1 : vector<8x16xf32>, vector<8x16xf32>, vector<8x16xf32>, vector<8x16xf32>, vector<8x16xf32> -> vector<8x80xf32>
    %56 = vector.broadcast %54 : vector<1x80xf32> to vector<8x80xf32>
    %57 = arith.subf %56, %55 : vector<8x80xf32>
    %58 = vector.extract_strided_slice %36 {offsets = [0, 0], sizes = [1, 16], strides = [1, 1]} : vector<5x16xf32> to vector<1x16xf32>
    %59 = vector.extract_strided_slice %36 {offsets = [1, 0], sizes = [1, 16], strides = [1, 1]} : vector<5x16xf32> to vector<1x16xf32>
    %60 = vector.extract_strided_slice %36 {offsets = [2, 0], sizes = [1, 16], strides = [1, 1]} : vector<5x16xf32> to vector<1x16xf32>
    %61 = vector.extract_strided_slice %36 {offsets = [3, 0], sizes = [1, 16], strides = [1, 1]} : vector<5x16xf32> to vector<1x16xf32>
    %62 = vector.extract_strided_slice %36 {offsets = [4, 0], sizes = [1, 16], strides = [1, 1]} : vector<5x16xf32> to vector<1x16xf32>
    %63 = tpu.concatenate %58, %59, %60, %61, %62 in 1 : vector<1x16xf32>, vector<1x16xf32>, vector<1x16xf32>, vector<1x16xf32>, vector<1x16xf32> -> vector<1x80xf32>
    %64 = tpu.concatenate %28, %28, %28, %28, %28 in 1 : vector<8x16xf32>, vector<8x16xf32>, vector<8x16xf32>, vector<8x16xf32>, vector<8x16xf32> -> vector<8x80xf32>
    %65 = vector.broadcast %63 : vector<1x80xf32> to vector<8x80xf32>
    %66 = arith.subf %65, %64 : vector<8x80xf32>
    %cst_23 = arith.constant 5.000000e-01 : f32
    %67 = vector.broadcast %cst_23 : f32 to vector<8x80xf32>
    %68 = arith.mulf %57, %67 : vector<8x80xf32>
    %69 = math.floor %68 : vector<8x80xf32>
    %cst_24 = arith.constant 2.000000e+00 : f32
    %70 = vector.broadcast %cst_24 : f32 to vector<8x80xf32>
    %71 = arith.mulf %70, %69 : vector<8x80xf32>
    %72 = arith.subf %57, %71 : vector<8x80xf32>
    %cst_25 = arith.constant 2.000000e+00 : f32
    %73 = vector.broadcast %cst_25 : f32 to vector<8x80xf32>
    %74 = arith.mulf %73, %72 : vector<8x80xf32>
    %cst_26 = arith.constant 1.000000e+00 : f32
    %75 = vector.broadcast %cst_26 : f32 to vector<8x80xf32>
    %76 = arith.subf %75, %74 : vector<8x80xf32>
    %cst_27 = arith.constant 3.000000e+01 : f32
    %77 = vector.broadcast %cst_27 : f32 to vector<8x80xf32>
    %78 = arith.minimumf %48, %77 : vector<8x80xf32>
    %79 = math.exp %78 : vector<8x80xf32>
    %80 = arith.mulf %76, %79 : vector<8x80xf32>
    %cst_28 = arith.constant 5.000000e-01 : f32
    %81 = vector.broadcast %cst_28 : f32 to vector<8x80xf32>
    %82 = arith.cmpf ogt, %66, %81 : vector<8x80xf32>
    %cst_29 = arith.constant 0.000000e+00 : f32
    %83 = vector.broadcast %cst_29 : f32 to vector<8x80xf32>
    %84 = arith.select %82, %83, %80 : vector<8x80xi1>, vector<8x80xf32>
    %85 = math.tanh %84 : vector<8x80xf32>
    %c0_30 = arith.constant 0 : index
    %c0_31 = arith.constant 0 : index
    %86 = vector.load %arg9[%c0_30, %c0_31] : memref<8x80xf32, #tpu.memory_space<vmem>>, vector<8x80xf32>
    %87 = arith.mulf %86, %85 : vector<8x80xf32>
    %88 = arith.truncf %87 : vector<8x80xf32> to vector<8x80xbf16>
    %c0_32 = arith.constant 0 : index
    %c0_33 = arith.constant 0 : index
    %89 = vector.load %arg5[%c0_32, %c0_33] : memref<80x16xbf16, #tpu.memory_space<vmem>>, vector<80x16xbf16>
    %cst_34 = arith.constant dense<0.000000e+00> : vector<8x16xf32>
    %90 = tpu.matmul %88, %89, %cst_34 {dimension_numbers = #tpu.dot_dimension_numbers<[1], [0], [0], [1], [0, 0, 1, 1], [], []>} : vector<8x80xbf16>, vector<80x16xbf16>, vector<8x16xf32> -> vector<8x16xf32>
    %c0_35 = arith.constant 0 : index
    %c0_36 = arith.constant 0 : index
    %91 = vector.load %arg6[%c0_35, %c0_36] : memref<1x16xf32, #tpu.memory_space<vmem>>, vector<1x16xf32>
    %92 = vector.broadcast %91 : vector<1x16xf32> to vector<8x16xf32>
    %93 = arith.addf %90, %92 : vector<8x16xf32>
    %c0_37 = arith.constant 0 : index
    %c0_38 = arith.constant 0 : index
    %94 = vector.load %arg8[%c0_37, %c0_38] : memref<8x5xf32, #tpu.memory_space<vmem>>, vector<8x5xf32>
    %cst_39 = arith.constant 0.000000e+00 : f32
    %95 = vector.broadcast %cst_39 : f32 to vector<5x16xf32>
    %96 = arith.maximumf %16, %95 : vector<5x16xf32>
    %cst_40 = arith.constant dense<0.000000e+00> : vector<8x16xf32>
    %97 = tpu.matmul %94, %96, %cst_40 {dimension_numbers = #tpu.dot_dimension_numbers<[1], [0], [0], [1], [0, 0, 1, 1], [], []>} : vector<8x5xf32>, vector<5x16xf32>, vector<8x16xf32> -> vector<8x16xf32>
    %98 = arith.addf %93, %97 : vector<8x16xf32>
    %cst_41 = arith.constant 0.000000e+00 : f32
    %99 = vector.broadcast %cst_41 : f32 to vector<8x16xf32>
    %100 = arith.maximumf %98, %99 : vector<8x16xf32>
    %c0_42 = arith.constant 0 : index
    %c0_43 = arith.constant 0 : index
    %101 = vector.load %arg11[%c0_42, %c0_43] : memref<8x16xf32, #tpu.memory_space<vmem>>, vector<8x16xf32>
    tpu.vector_store %arg11[%c0_42, %c0_43], %100 {strides = array<i32>} : memref<8x16xf32, #tpu.memory_space<vmem>>, vector<8x16xf32>,
    return
  }
}

</mosaic_0001>

<bundles_post_ra>
// kernel: tpu_custom_call.1
= control target key start
LH: loop header
LB: loop body
LE: loop exit
PB: predicated region body
PF: predicated region fallthrough
CT: control target
= control target key end

     0   :  { %v1089_v1 = vmov 0.0   ;;  %vm1090_vm0 = vmmov 0   ;;  %vm64_vm1 = vcmask 261120   ;;  %s1362_s0 = inlined_call_operand.vmem [shape: bf16[8,32], index: 0, kind: input, shape index: {}]   ;;  %s1363_s1 = inlined_call_operand.vmem [shape: bf16[32,48], index: 1, kind: input, shape index: {}]   ;;  %s1364_s2 = inlined_call_operand.vmem [shape: f32[1,48], index: 2, kind: input, shape index: {}]   ;;  %s1365_s3 = inlined_call_operand.vmem [shape: bf16[48,16], index: 3, kind: input, shape index: {}]   ;;  %s1366_s4 = inlined_call_operand.vmem [shape: f32[1,16], index: 4, kind: input, shape index: {}]   ;;  %s1367_s5 = inlined_call_operand.vmem [shape: bf16[80,16], index: 5, kind: input, shape index: {}]   ;;  %s1368_s6 = inlined_call_operand.vmem [shape: f32[1,16], index: 6, kind: input, shape index: {}]   ;;  %s1369_s7 = inlined_call_operand.vmem [shape: f32[8,5], index: 7, kind: input, shape index: {}]   ;;  %s1370_s8 = inlined_call_operand.vmem [shape: f32[8,5], index: 8, kind: input, shape index: {}]   ;;  %s1371_s9 = inlined_call_operand.vmem [shape: f32[8,80], index: 9, kind: input, shape index: {}]   ;;  %s1372_s10 = inlined_call_operand.vmem [shape: f32[5,1], index: 10, kind: input, shape index: {}]   ;;  %s1373_s11 = inlined_call_operand.hbm [shape: f32[8,16], index: 11, kind: output, shape index: {}]  }
   0x1   :  { %v1051_v0 = vld [vmem:[%s1363_s1 + $0x8] sm:$0xff]   ;;  %979 = vmatprep.subr.bf16.mxu1 %v1089_v1  ;;  %997 = vmatprep.subr.mxu0 %v1089_v1  ;;  %v1052_v2 = vld [vmem:[%s1363_s1] sm:$0xff]   ;;  %v1053_v5 = vld [vmem:[%s1365_s3 + $0x10] sm:$0xff]  }
   0x2   :  { %980 = vmatpush3.bf16.msra.mxu1 %v1051_v0  ;;  %983 = vmatprep.mubr.msk.bf16.mxu1 %vm1090_vm0, %v1089_v1  ;;  %v185_v3 = vld [vmem:[%s1369_s7] sm:$0xff] }
   0x3   :  { %981 = vmatprep.subr.bf16.mxu1 %v1089_v1  ;;  %186 = vxpose.xlu0.b32.start.end [1/1] (short) (narrow) %v185_v3, 8  ;;  %v40_v4 = vld [vmem:[%s1362_s0] sm:$0xf] }
   0x4   :  { %999 = vmatprep.mubr.msk.f32.mxu0 %vm1090_vm0, %v1089_v1 }
   0x6   :  { %982 = vmatpush3.bf16.msra.mxu1 %v1052_v2 }
   0x7   :  { %987 = vmatprep.subr.bf16.mxu1 %v1089_v1 }
   0x9   :  { %984 = vmatmul.mubr.msk.bf16.vlgmr.msra.gmra.mxu1 %vm64_vm1, %v40_v4 }
   0xa   :  { %16 = vsyncpa [#allocation3], 0  ;;  %988 = vmatpush3.bf16.msra.mxu1 %v1053_v5  ;;  %993 = vmatprep.mubr.msk.bf16.mxu1 %vm1090_vm0, %v1089_v1  ;;  %v585_v6 = vld [vmem:[%s1372_s10] sm:$0x1f]  ;;  %v1091_v7 = vmov 0   ;;  %v1054_v8 = vld [vmem:[%s1365_s3 + $0x8] sm:$0xff]  }
   0xb   :  { %989 = vmatprep.subr.bf16.mxu1 %v1089_v1  ;;  %v1055_v9 = vld [vmem:[%s1365_s3] sm:$0xff]   ;;  %vm141_vm3 = vcmask 392192   ;;  %s1092_s3 = smov 48   ;;  %s1093_s10 = smov 16   ;;  %vm218_vm4 = vcmask 64512   ;;  %v1096_v27 = vmov 1.0  }
   0xc   :  { %v927_v10 = vld [vmem:[%s1364_s2] ss:$0 sm:$0xff]  ;;  %s1094_s2 = smov 32   ;;  %s1095_s13 = smov 64   ;;  %vm836_vm6 = vcmask 1044480   ;;  %v1057_v63 = vld [vmem:[%s1367_s5 + $0x18] sm:$0xff]  }
   0xd   :  { %v931_v28 = vld [vmem:[%s1366_s4] ss:$0 sm:$0xff]  ;;  %v1058_v0 = vld [vmem:[%s1367_s5 + $0x10] sm:$0xff]   ;;  %v1059_v2 = vld [vmem:[%s1367_s5 + $0x8] sm:$0xff]   ;;  %vm832_vm7 = vcmask 39936   ;;  %vm609_vm8 = vcmask 130048  }
   0xe   :  { %990 = vmatpush3.bf16.msra.mxu1 %v1054_v8  ;;  %v1056_v62 = vld [vmem:[%s1367_s5 + $0x20] sm:$0xff]   ;;  %vm613_vm9 = vcmask 523264   ;;  %vm786_vm11 = vcmask 654336   ;;  %s1097_s7 = smov [#allocation2]  }
   0xf   :  { %991 = vmatprep.subr.bf16.mxu1 %v1089_v1  ;;  %v1060_v3 = vld [vmem:[%s1367_s5] sm:$0xff]   ;;  %s919_s27 = sshll.u32 %s1097_s7, 4  ;;  %s920_s27 = int_to_ptr.vmem [resolvable:$true] %s919_s27 }
  0x10   :  { %v830_v4 = vld [vmem:[%s1370_s8] sm:$0xff]  ;;  %p1072_p1 = scmp.lt.s32.totalorder %s920_s27, %s920_s27 }
  0x12   :  { %992 = vmatpush3.bf16.msra.mxu1 %v1055_v9 }
  0x13   :  { %1007 = vmatprep.subr.mxu1 %v1089_v1 }
  0x2c   :  { %1050 = vset.pattern.permute.xlu0 %v1091_v7 }
  0x2d   :  { %588 = vperm.xlu0 %1050, %v585_v6  }
  0x7f   :  { %v202_v25 = vpop.trf.xlu0 }
  0xa8   :  { %v589_v44 = vpop.permute.xlu0 %588 }
  0xc9   :  { %v102_v11 = vpop.f32.mrf.mxu1 }
  0xca   :  { %v103_v12 = vadd.f32 %v927_v10, %v102_v11 }
  0xcb   :  { %v985_v13 = vpop.f32.mrf.mxu1 }
  0xcc   :  { %v108_v14 = vmax.f32 %v103_v12, 0.0  ;;  %v292_v15 = vand.u32 2147483647, %v103_v12  ;;  %vm296_vm2 = vcmp.lt.f32.partialorder %v103_v12, 0.0  ;;  %v632_v13 = vlaneseq }
  0xcd   :  { %v105_v16 = vpop.f32.mrf.mxu1  ;;  %v1201_v17 = vsel %vm296_vm2, 1.0, %v1089_v1 }
  0xce   :  { %v109_v18 = vpack.c.bf16 %v108_v14, %v108_v14  ;;  %v293_v19 = vmax.f32 %v292_v15, 1e-30  ;;  %665 = vrot.lane.b32.xlu0 %v1201_v17, %s1092_s3  ;;  %659 = vrot.lane.b32.xlu1 %v1201_v17, %s1093_s10  ;;  %vm1224_vm5 = vcmp.lt.f32.partialorder %v292_v15, 1e-30  ;;  %v633_v15 = vshrl.u32 %v632_v13, 7 }
  0xcf   :  { %v986_v20 = vpop.f32.mrf.mxu1  ;;  %v1283_v58 = vsel %vm1224_vm5, 1.0, %v1089_v1 }
  0xd0   :  { %1061 = vlog2.f32 %v293_v19  ;;  %994 = vmatmul.mubr.msk.bf16.vlgmr.msra.gmra.mxu1 %vm141_vm3, %v109_v18  ;;  %v634_v18 = vsub.s32 0, %v633_v15  ;;  %v945_v15 = vld [vmem:[%s1368_s6] ss:$0 sm:$0xff] }
  0xd1   :  { %1009 = vmatprep.mubr.msk.f32.mxu1 %vm1090_vm0, %v1089_v1 }
  0xd2   :  { %662 = vrot.lane.b32.xlu1 %v1201_v17, %s1094_s2 }
  0xd6   :  { %668 = vrot.lane.b32.xlu1 %v1201_v17, %s1095_s13 }
  0xdd   :  { %v1062_v21 = vpop.eup %1061 }
  0xde   :  { %v1214_v22 = vmul.f32 0.6931472, %v1062_v21 }
  0xe0   :  { %616 = vrot.lane.b32.xlu1 %v1214_v22, %s1093_s10  ;;  %v302_v23 = vpack.c.bf16 %v1214_v22, %v1214_v22 }
  0xe2   :  { %v303_v24 = vunpack.c.l.bf16 %v302_v23 }
  0xe4   :  { %619 = vrot.lane.b32.xlu1 %v1214_v22, %s1094_s2  ;;  %1008 = vmatpush3.msra.mxu1 %v303_v24  ;;  %v304_v32 = vsub.f32 %v1214_v22, %v303_v24 }
  0xe5   :  { %1017 = vmatprep.subr.mxu1 %v1089_v1  ;;  %1010 = vmatmul.mubr.msk.f32.vlgmr.msra.gmra.mxu1 %vm218_vm4, %v202_v25 }
  0xe6   :  { %1018 = vmatpush3.msk.msra.mxu1 %vm1224_vm5, %v1096_v27  ;;  %1019 = vmatprep.mubr.msk.f32.mxu1 %vm1090_vm0, %v1089_v1 }
  0xe7   :  { %1036 = vmatprep.subr.mxu1 %v1089_v1 }
  0xe8   :  { %622 = vrot.lane.b32.xlu1 %v1214_v22, %s1092_s3 }
  0xe9   :  { %1020 = vmatmul.mubr.msk.f32.vlgmr.msra.gmra.mxu1 %vm218_vm4, %v202_v25 }
  0xea   :  { %1038 = vmatprep.mubr.msk.f32.mxu1 %vm1090_vm0, %v1089_v1 }
  0xec   :  { %625 = vrot.lane.b32.xlu1 %v1214_v22, %s1095_s13 }
 0x140   :  { %v660_v5 = vpop.permute.xlu1 %659  ;;  %v666_v19 = vpop.permute.xlu0 %665 }
 0x144   :  { %v663_v6 = vpop.permute.xlu1 %662 }
 0x148   :  { %v669_v7 = vpop.permute.xlu1 %668 }
 0x152   :  { %v617_v8 = vpop.permute.xlu1 %616 }
 0x153   :  { %v628_v24 = vsel %vm609_vm8, %v1214_v22, %v617_v8 }
 0x156   :  { %v620_v9 = vpop.permute.xlu1 %619 }
 0x157   :  { %v629_v26 = vsel %vm64_vm1, %v628_v24, %v620_v9  ;;  %v736_v9 = vld [vmem:[%s1371_s9] sm:$0xff]  ;;  %s1067_s9 = scalar_lea.vmem %s920_s27, 128 }
 0x158   :  { %p1068_p0 = scmp.ne.s32.totalorder %s920_s27, %s1067_s9  ;;  %p1073_p2 = scmp.lt.s32.totalorder %s1067_s9, %s1067_s9 }
 0x15a   :  { %v623_v10 = vpop.permute.xlu1 %622  ;;  %p1074_p3 = por %p1073_p2, %p1072_p1 }
 0x15c   :  { %p1075_p4 = pnand %p1074_p3, %p1068_p0 }
 0x15e   :  { %v626_v11 = vpop.permute.xlu1 %625 }
 0x190   :  { %v179_v29 = vpop.f32.mrf.mxu1 }
 0x191   :  { %v180_v30 = vadd.f32 %v931_v28, %v179_v29  ;;  %v630_v28 = vsel %vm141_vm3, %v629_v26, %v623_v10 }
 0x192   :  { %v995_v31 = vpop.f32.mrf.mxu1 }
 0x193   :  { %998 = vmatpush3.msra.mxu0 %v180_v30  ;;  %v631_v30 = vsel %vm613_vm9, %v630_v28, %v626_v11 }
 0x194   :  { %v182_v33 = vpop.f32.mrf.mxu1  ;;  %1000 = vmatmul.mubr.msk.f32.vlgmr.msra.gmra.mxu0 %vm218_vm4, %v202_v25  ;;  %1002 = vmatprep.subr.mxu0 %v1089_v1 }
 0x195   :  { %1003 = vmatpush3.msra.mxu0 %v304_v32  ;;  %1004 = vmatprep.mubr.msk.f32.mxu0 %vm1090_vm0, %v1089_v1 }
 0x196   :  { %v996_v34 = vpop.f32.mrf.mxu1  ;;  %1012 = vmatprep.subr.mxu0 %v1089_v1 }
 0x198   :  { %1005 = vmatmul.mubr.msk.f32.vlgmr.msra.gmra.mxu0 %vm218_vm4, %v202_v25 }
 0x199   :  { %1013 = vmatpush3.msk.msra.mxu0 %vm296_vm2, %v1096_v27  ;;  %1014 = vmatprep.mubr.msk.f32.mxu0 %vm1090_vm0, %v1089_v1 }
 0x19a   :  { %1022 = vmatprep.subr.bf16.mxu0 %v1089_v1 }
 0x19c   :  { %1015 = vmatmul.mubr.msk.f32.vlgmr.msra.gmra.mxu0 %vm218_vm4, %v202_v25 }
 0x19d   :  { %1032 = vmatprep.mubr.msk.bf16.mxu0 %vm1090_vm0, %v1089_v1  ;;  %1023 = vmatpush3.bf16.msra.mxu0 %v1056_v62 }
 0x19e   :  { %1024 = vmatprep.subr.bf16.mxu0 %v1089_v1 }
 0x1a1   :  { %1025 = vmatpush3.bf16.msra.mxu0 %v1057_v63 }
 0x1a2   :  { %1026 = vmatprep.subr.bf16.mxu0 %v1089_v1 }
 0x1a5   :  { %v441_v35 = vpop.f32.mrf.mxu1  ;;  %1027 = vmatpush3.bf16.msra.mxu0 %v1058_v0 }
 0x1a6   :  { %1028 = vmatprep.subr.bf16.mxu0 %v1089_v1 }
 0x1a7   :  { %v1011_v36 = vpop.f32.mrf.mxu1 }
 0x1a8   :  { %v671_v36 = vsel %vm609_vm8, %v1201_v17, %v660_v5 }
 0x1a9   :  { %v1257_v37 = vpop.f32.mrf.mxu1  ;;  %1029 = vmatpush3.bf16.msra.mxu0 %v1059_v2 }
 0x1aa   :  { %v681_v52 = vrot.slane %v1257_v37, 1  ;;  %v689_v54 = vrot.slane %v1257_v37, 3  ;;  %v693_v56 = vrot.slane %v1257_v37, 4  ;;  %v685_v61 = vrot.slane %v1257_v37, 2  ;;  %1030 = vmatprep.subr.bf16.mxu0 %v1089_v1 }
 0x1ab   :  { %v1021_v38 = vpop.f32.mrf.mxu1 }
 0x1ac   :  { %v672_v38 = vsel %vm64_vm1, %v671_v36, %v663_v6 }
 0x1ad   :  { %1031 = vmatpush3.bf16.msra.mxu0 %v1060_v3 }
 0x254   :  { %v288_v39 = vpop.f32.mrf.mxu0 }
 0x255   :  { %v831_v40 = vmax.f32 %v288_v39, 0.0 }
 0x256   :  { %v1001_v41 = vpop.f32.mrf.mxu0 }
 0x257   :  { %1037 = vmatpush3.msk.msra.mxu1 %vm836_vm6, %v831_v40 }
 0x258   :  { %v371_v42 = vpop.f32.mrf.mxu0  ;;  %1039 = vmatmul.mubr.msk.f32.vlgmr.msra.gmra.mxu1 %vm832_vm7, %v830_v4 }
 0x259   :  { %v442_v43 = vadd.f32 %v441_v35, %v371_v42 }
 0x25a   :  { %v1006_v45 = vpop.f32.mrf.mxu0 }
 0x25b   :  { %v1259_v46 = vadd.f32 %v589_v44, %v442_v43  ;;  %v673_v44 = vsel %vm141_vm3, %v672_v38, %v666_v19 }
 0x25c   :  { %v1261_v47 = vpop.f32.mrf.mxu0 }
 0x25d   :  { %v650_v48 = vrot.slane %v1261_v47, 4  ;;  %v593_v49 = vrot.slane %v1259_v46, 1  ;;  %v597_v51 = vrot.slane %v1259_v46, 2  ;;  %v601_v53 = vrot.slane %v1259_v46, 3 }
 0x25e   :  { %v1016_v50 = vpop.f32.mrf.mxu0  ;;  %v605_v55 = vrot.slane %v1259_v46, 4  ;;  %v638_v57 = vrot.slane %v1261_v47, 1  ;;  %v642_v59 = vrot.slane %v1261_v47, 2  ;;  %v646_v60 = vrot.slane %v1261_v47, 3 }
 0x25f   :  { %651 = vrot.lane.b32.xlu0 %v650_v48, %s1095_s13  ;;  %594 = vrot.lane.b32.xlu1 %v593_v49, %s1093_s10  ;;  %v674_v48 = vsel %vm613_vm9, %v673_v44, %v669_v7 }
 0x263   :  { %598 = vrot.lane.b32.xlu1 %v597_v51, %s1094_s2  ;;  %682 = vrot.lane.b32.xlu0 %v681_v52, %s1093_s10 }
 0x267   :  { %602 = vrot.lane.b32.xlu1 %v601_v53, %s1092_s3  ;;  %690 = vrot.lane.b32.xlu0 %v689_v54, %s1092_s3 }
 0x26b   :  { %606 = vrot.lane.b32.xlu1 %v605_v55, %s1095_s13  ;;  %694 = vrot.lane.b32.xlu0 %v693_v56, %s1095_s13 }
 0x26f   :  { %639 = vrot.lane.b32.xlu1 %v638_v57, %s1093_s10  ;;  %708 = vrot.lane.b32.xlu0 %v1283_v58, %s1092_s3 }
 0x273   :  { %643 = vrot.lane.b32.xlu1 %v642_v59, %s1094_s2 }
 0x277   :  { %647 = vrot.lane.b32.xlu1 %v646_v60, %s1092_s3 }
 0x27b   :  { %686 = vrot.lane.b32.xlu1 %v685_v61, %s1094_s2 }
 0x27f   :  { %702 = vrot.lane.b32.xlu1 %v1283_v58, %s1093_s10 }
 0x283   :  { %705 = vrot.lane.b32.xlu1 %v1283_v58, %s1094_s2 }
 0x287   :  { %711 = vrot.lane.b32.xlu1 %v1283_v58, %s1095_s13 }
 0x2d1   :  { %v595_v12 = vpop.permute.xlu1 %594  ;;  %v652_v29 = vpop.permute.xlu0 %651 }
 0x2d2   :  { %v610_v1 = vsel %vm609_vm8, %v1259_v46, %v595_v12 }
 0x2d5   :  { %v599_v14 = vpop.permute.xlu1 %598  ;;  %v683_v34 = vpop.permute.xlu0 %682 }
 0x2d6   :  { %v611_v20 = vsel %vm64_vm1, %v610_v1, %v599_v14 }
 0x2d9   :  { %v603_v16 = vpop.permute.xlu1 %602  ;;  %v691_v45 = vpop.permute.xlu0 %690 }
 0x2da   :  { %v612_v21 = vsel %vm141_vm3, %v611_v20, %v603_v16 }
 0x2dd   :  { %v607_v23 = vpop.permute.xlu1 %606  ;;  %v695_v53 = vpop.permute.xlu0 %694 }
 0x2de   :  { %v614_v25 = vsel %vm613_vm9, %v612_v21, %v607_v23 }
 0x2df   :  { %v635_v27 = vrot.slane %v614_v25, %v634_v18 }
 0x2e1   :  { %v640_v31 = vpop.permute.xlu1 %639  ;;  %v636_v32 = vsub.f32 %v635_v27, %v631_v30  ;;  %v709_v63 = vpop.permute.xlu0 %708 }
 0x2e2   :  { %v654_v22 = vsel %vm609_vm8, %v1261_v47, %v640_v31  ;;  %v697_v47 = vsel %vm609_vm8, %v1257_v37, %v683_v34 }
 0x2e3   :  { %v729_v35 = vmin.f32 %v636_v32, 30.0 }
 0x2e5   :  { %v644_v33 = vpop.permute.xlu1 %643  ;;  %v730_v41 = vmul.f32 1.442695, %v729_v35 }
 0x2e6   :  { %v655_v39 = vsel %vm64_vm1, %v654_v22, %v644_v33 }
 0x2e7   :  { %1063 = vpow2.f32 %v730_v41 }
 0x2e9   :  { %v648_v40 = vpop.permute.xlu1 %647 }
 0x2ea   :  { %v656_v42 = vsel %vm141_vm3, %v655_v39, %v648_v40 }
 0x2eb   :  { %v657_v43 = vsel %vm613_vm9, %v656_v42, %v652_v29 }
 0x2ec   :  { %v678_v46 = vrot.slane %v657_v43, %v634_v18 }
 0x2ed   :  { %v687_v17 = vpop.permute.xlu1 %686 }
 0x2ee   :  { %v679_v49 = vsub.f32 %v678_v46, %v674_v48  ;;  %v698_v51 = vsel %vm64_vm1, %v697_v47, %v687_v17 }
 0x2ef   :  { %v699_v55 = vsel %vm141_vm3, %v698_v51, %v691_v45 }
 0x2f0   :  { %v723_v50 = vmul.f32 0.5, %v679_v49  ;;  %v700_v62 = vsel %vm613_vm9, %v699_v55, %v695_v53 }
 0x2f1   :  { %v703_v52 = vpop.permute.xlu1 %702  ;;  %v721_v3 = vrot.slane %v700_v62, %v634_v18 }
 0x2f2   :  { %v724_v54 = vfloor.f32 %v723_v50  ;;  %v714_v57 = vsel %vm609_vm8, %v1283_v58, %v703_v52 }
 0x2f4   :  { %v725_v56 = vmul.f32 2.0, %v724_v54  ;;  %v1064_v6 = vpop.eup %1063 }
 0x2f5   :  { %v706_v59 = vpop.permute.xlu1 %705 }
 0x2f6   :  { %v726_v60 = vsub.f32 %v679_v49, %v725_v56  ;;  %v715_v61 = vsel %vm64_vm1, %v714_v57, %v706_v59 }
 0x2f7   :  { %v716_v2 = vsel %vm141_vm3, %v715_v61, %v709_v63 }
 0x2f8   :  { %v727_v37 = vmul.f32 2.0, %v726_v60 }
 0x2f9   :  { %v712_v0 = vpop.permute.xlu1 %711 }
 0x2fa   :  { %v728_v4 = vsub.f32 1.0, %v727_v37  ;;  %v717_v5 = vsel %vm613_vm9, %v716_v2, %v712_v0 }
 0x2fb   :  { %v722_v7 = vsub.f32 %v721_v3, %v717_v5 }
 0x2fc   :  { %v732_v8 = vmul.f32 %v1064_v6, %v728_v4 }
 0x2fd   :  { %vm733_vm10 = vcmp.gt.f32.partialorder %v722_v7, 0.5 }
 0x2fe   :  { %v734_v58 = vsel %vm733_vm10, 0.0, %v732_v8 }
 0x2ff   :  { %1065 = vtanh.f32 %v734_v58 }
 0x30c   :  { %v1066_v10 = vpop.eup %1065 }
 0x30d   :  { %v737_v11 = vmul.f32 %v1066_v10, %v736_v9 }
 0x30f   :  { %v738_v12 = vpack.c.bf16 %v737_v11, %v737_v11 }
 0x311   :  { %1033 = vmatmul.mubr.msk.bf16.vlgmr.msra.gmra.mxu0 %vm786_vm11, %v738_v12 }
 0x318   :  { %v906_v13 = vpop.f32.mrf.mxu1 }
 0x31a   :  { %v1040_v14 = vpop.f32.mrf.mxu1 }
 0x3d1   :  { %v824_v16 = vpop.f32.mrf.mxu0 }
 0x3d2   :  { %v825_v1 = vadd.f32 %v945_v15, %v824_v16 }
 0x3d3   :  { %v1034_v18 = vpop.f32.mrf.mxu0 }
 0x3d4   :  { %v910_v19 = vadd.f32 %v906_v13, %v825_v1 }
 0x3d5   :  { %v827_v20 = vpop.f32.mrf.mxu0 }
 0x3d6   :  { %v911_v21 = vmax.f32 %v910_v19, 0.0 }
 0x3d7   :  { %v1035_v23 = vpop.f32.mrf.mxu0 }
 0x3d8   :  { %912 = vst.msk [vmem:[#allocation2] sm:$0xff] %vm609_vm8, %v911_v21 }
 0x3d9   :  { %1078 = shalt.err (!%p1075_p4)
}
 0x3da   :  { %922 = dma.vmem_to_hbm [thread:$0]  %s920_s27, 128, %s1373_s11, [#allocation3]  }
 0x3db   :  { %1087 = dma.done.wait [#allocation3], 128  }
 0x3dc   :  { %1088 = vsyncadd [#allocation3], 4294967168 }
 0x3dd   :  { %926 = vsyncpa [#allocation3], 1 }

</bundles_post_ra>
